<compile_context>
chip_gen: v7x
topology: tpu7x:2x2x1
jax: 0.10.0
libtpu: 0.0.40
codegen_flags: <defaults>
</compile_context>

<pallas_src>
import functools

import jax
import jax.numpy as jnp
from jax import lax
from jax.experimental import pallas as pl
from jax.experimental.pallas import tpu as pltpu


def _simple_rmsnorm_kernel(x_ref, o_ref, *, scale, eps):
    # Per-row sum of squares with f32 accumulation, one per-row rsqrt on the
    # EUP (dim**-0.5 folded in), then a single f32 multiply cast on store.
    xf = x_ref[...].astype(jnp.float32)
    sq_sum = jnp.sum(xf * xf, axis=-1, keepdims=True)
    # x / max(||x||, eps) == x * rsqrt(max(sq_sum, eps^2)); eps^2 = 1e-24 is a
    # normal f32, so the clamp_min semantics are preserved.
    inv = jnp.float32(scale) * lax.rsqrt(jnp.maximum(sq_sum, jnp.float32(eps * eps)))
    o_ref[...] = (xf * inv).astype(o_ref.dtype)


def _vmem_capacity_bytes():
    """Physical VMEM of the current generation; fall back to v7x's 64 MiB."""
    try:
        return int(pltpu.get_tpu_info().vmem_capacity_bytes)
    except Exception:
        return 64 * 1024 * 1024


def _vmem_limit_bytes(capacity_bytes):
    # <= half of physical VMEM, never more than 48 MiB: plenty for ~4 MiB
    # double-buffered tiles and leaves headroom for Mosaic internal scratch.
    return min(capacity_bytes // 2, 48 * 1024 * 1024)


def _pick_block_rows(n_rows, dim, dtype, vmem_capacity_bytes):
    """Row-tile size: ~4 MiB input bytes/step, >=8 grid steps, VMEM-safe."""
    itemsize = jnp.dtype(dtype).itemsize
    sublane = {4: 8, 2: 16, 1: 32}.get(itemsize, 8)

    # Per-row VMEM cost of tile buffering: double-buffered input + output in
    # the input dtype plus f32 streaming temporaries (xf and xf*xf can coexist
    # for sub-32-bit inputs, so budget 8 B/elem there).
    f32_temp_bytes = 4 if itemsize >= 4 else 8
    per_row_bytes = dim * (4 * itemsize + f32_temp_bytes)

    # ~4 MiB of input bytes per grid step: at/above the measured HBM-roofline
    # plateau and large enough that the ~0.35 us per-step overhead stays <10%
    # even at v7x's ~3.2 TB/s HBM.
    target_input_bytes = 4 * 1024 * 1024
    block = max(1, target_input_bytes // max(1, dim * itemsize))

    # Cap total tile buffering at ~25% of physical VMEM (v7x headroom).
    vmem_tile_budget = vmem_capacity_bytes // 4
    block = min(block, max(1, vmem_tile_budget // per_row_bytes))

    # Keep the grid at >= ~8 steps when rows allow it: DMA prefetch/writeback
    # overlap and both TensorCores active on v7x.
    block = min(block, max(1, pl.cdiv(n_rows, 8)))

    # Sublane-align (never below one packed sublane group) and don't exceed
    # the sublane-rounded-up row count.
    block = max(sublane, (block // sublane) * sublane)
    block = min(block, pl.cdiv(n_rows, sublane) * sublane)
    return block


def simple_rmsnorm(x, *, eps=1e-12, block_rows=None):
    """F.normalize(x, dim=-1) * dim**-0.5, computed with a Pallas TPU kernel."""
    orig_shape = x.shape
    dim = orig_shape[-1]
    scale = float(dim) ** -0.5

    x2d = x.reshape(-1, dim)
    n_rows = x2d.shape[0]

    vmem_capacity = _vmem_capacity_bytes()
    if block_rows is None:
        block_rows = _pick_block_rows(n_rows, dim, x.dtype, vmem_capacity)

    grid = pl.cdiv(n_rows, block_rows)  # partial last block is masked by Pallas

    itemsize = jnp.dtype(x.dtype).itemsize
    cost = pl.CostEstimate(
        flops=3 * n_rows * dim,           # square + add-reduce + scale multiply
        transcendentals=n_rows,           # one rsqrt per row
        bytes_accessed=2 * n_rows * dim * itemsize,
    )

    kernel = functools.partial(_simple_rmsnorm_kernel, scale=scale, eps=eps)

    out2d = pl.pallas_call(
        kernel,
        out_shape=jax.ShapeDtypeStruct((n_rows, dim), x.dtype),
        grid_spec=pltpu.PrefetchScalarGridSpec(
            num_scalar_prefetch=0,
            grid=(grid,),
            in_specs=[pl.BlockSpec((block_rows, dim), lambda i: (i, 0))],
            out_specs=pl.BlockSpec((block_rows, dim), lambda i: (i, 0)),
        ),
        compiler_params=pltpu.CompilerParams(
            dimension_semantics=("parallel",),   # shards row-tiles across TCs (v7x)
            vmem_limit_bytes=_vmem_limit_bytes(vmem_capacity),
        ),
        cost_estimate=cost,
    )(x2d)

    return out2d.reshape(orig_shape)


def _reference(x, eps=1e-12):
    dim = x.shape[-1]
    scale = float(dim) ** -0.5
    xf = x.astype(jnp.float32)
    norm = jnp.sqrt(jnp.sum(jnp.square(xf), axis=-1, keepdims=True))
    return (xf / jnp.maximum(norm, eps) * scale).astype(x.dtype)


if __name__ == "__main__":
    key = jax.random.PRNGKey(0)

    # 1) Module-shaped smoke test (batch=2, seq=8, hidden=32) in f32.
    batch, seq, hidden = 2, 8, 32   # dim = 32 => scale = 32**-0.5
    x = jax.random.normal(key, (batch, seq, hidden), dtype=jnp.float32)
    out = jax.block_until_ready(simple_rmsnorm(x))
    ref = _reference(x)
    assert out.shape == x.shape and out.dtype == x.dtype
    assert jnp.allclose(out, ref, atol=1e-5, rtol=1e-5)

    # 2) Partial-last-block test: 15 rows with an 8-row block exercises the
    #    masked (out-of-bounds) final tile.
    k2 = jax.random.PRNGKey(0)
    x2 = jax.random.normal(k2, (3, 5, 128), dtype=jnp.float32)
    out2 = jax.block_until_ready(simple_rmsnorm(x2, block_rows=8))
    ref2 = _reference(x2)
    assert out2.shape == x2.shape and out2.dtype == x2.dtype
    assert jnp.allclose(out2, ref2, atol=1e-5, rtol=1e-5)

    # 3) bf16 path: f32 math internally, single rounding on store.
    k3 = jax.random.PRNGKey(0)
    x3 = jax.random.normal(k3, (4, 16, 256), dtype=jnp.bfloat16)
    out3 = jax.block_until_ready(simple_rmsnorm(x3))
    ref3 = _reference(x3)
    assert out3.shape == x3.shape and out3.dtype == x3.dtype
    assert jnp.allclose(out3.astype(jnp.float32), ref3.astype(jnp.float32),
                        atol=1e-2, rtol=1e-2)

    print("KERNEL_OK")
</pallas_src>

<mosaic_0001>
module attributes {stable_mosaic.version = 11 : i64} {
  func.func @_simple_rmsnorm_kernel(%arg0: i32, %arg1: memref<8x32xf32, #tpu.memory_space<vmem>>, %arg2: memref<8x32xf32, #tpu.memory_space<vmem>>) attributes {dimension_semantics = [#tpu.dimension_semantics<parallel>], iteration_bounds = array<i64: 2>, scalar_prefetch = 0 : i64, scratch_operands = 0 : i64, tpu.core_type = #tpu.core_type<tc>, window_params = [{transform_indices = @transform_0, window_bounds = array<i64: 8, 32>}, {transform_indices = @transform_1, window_bounds = array<i64: 8, 32>}]} {
    %c0 = arith.constant 0 : index
    %c0_0 = arith.constant 0 : index
    %0 = vector.load %arg1[%c0, %c0_0] : memref<8x32xf32, #tpu.memory_space<vmem>>, vector<8x32xf32>
    %1 = arith.mulf %0, %0 : vector<8x32xf32>
    %cst = arith.constant dense<0.000000e+00> : vector<8xf32>
    %2 = vector.multi_reduction <add>, %1, %cst [1] : vector<8x32xf32> to vector<8xf32>
    %3 = vector.shape_cast %2 : vector<8xf32> to vector<8x1xf32>
    %cst_1 = arith.constant 1.000000e-24 : f32
    %4 = vector.broadcast %cst_1 : f32 to vector<8x1xf32>
    %5 = arith.maximumf %3, %4 : vector<8x1xf32>
    %6 = math.rsqrt %5 : vector<8x1xf32>
    %cst_2 = arith.constant 0.176776692 : f32
    %7 = vector.broadcast %cst_2 : f32 to vector<8x1xf32>
    %8 = arith.mulf %7, %6 : vector<8x1xf32>
    %9 = vector.broadcast %8 : vector<8x1xf32> to vector<8x32xf32>
    %10 = arith.mulf %0, %9 : vector<8x32xf32>
    %c0_3 = arith.constant 0 : index
    %c0_4 = arith.constant 0 : index
    %11 = vector.load %arg2[%c0_3, %c0_4] : memref<8x32xf32, #tpu.memory_space<vmem>>, vector<8x32xf32>
    tpu.vector_store %arg2[%c0_3, %c0_4], %10 {strides = array<i32>} : memref<8x32xf32, #tpu.memory_space<vmem>>, vector<8x32xf32>,
    return
  }
  func.func @transform_0(%arg0: i32) -> (i32, i32) {
    %c0_i32 = arith.constant 0 : i32
    %c0_i32_0 = arith.constant 0 : i32
    return %arg0, %c0_i32 : i32, i32
  }
  func.func @transform_1(%arg0: i32) -> (i32, i32) {
    %c0_i32 = arith.constant 0 : i32
    %c0_i32_0 = arith.constant 0 : i32
    return %arg0, %c0_i32 : i32, i32
  }
}

</mosaic_0001>

<bundles_post_ra>
// kernel: tpu_custom_call.1
= control target key start
LH: loop header
LB: loop body
LE: loop exit
PB: predicated region body
PF: predicated region fallthrough
CT: control target
= control target key end

     0   :  { %6 = vsyncpa [#allocation3], 0  ;;  %s558_s0 = inlined_call_operand.hbm [shape: f32[16,32], index: 0, kind: input, shape index: {}]   ;;  %s559_s1 = inlined_call_operand.hbm [shape: f32[16,32], index: 1, kind: output, shape index: {}]  }
   0x1   :  { %8 = vsyncpa [#allocation3 + $0x1], 0 }
   0x2   :  { %9 = vsyncpa [#allocation4], 0 }
   0x3   :  { %11 = vsyncpa [#allocation4 + $0x1], 0  ;;  %s397_s6 = smov 0   ;;  %s399_s7 = smov 0  }
   0x4   :  { %s401_s8 = smov 0   ;;  %s403_s9 = smov 0  }
   0x5 LB: > { %s418_s10 = sadd.s32 4294967295, %s383_s9   ;;  %s227_s11 = sadd.s32 4294967294, %s383_s9   ;;  %s383_s9 = sphi %s403_s9, %s574_s9   ;;  %s379_s8 = sphi %s401_s8, %s573_s8   ;;  %s375_s7 = sphi %s399_s7, %s572_s7   ;;  %s371_s6 = sphi %s397_s6, %s571_s6  }
   0x6   : > { %s422_s12 = sadd.s32 1, %s383_s9   ;;  %s24_s13 = sadd.s32 1, %s379_s8 }
   0x7   : > { %s21_s14 = ssub.s32 %s383_s9, %s422_s12  ;;  %p31_p0 = scmp.ne.s32.totalorder %s379_s8, %s375_s7 }
   0x8   : > { %p22_p1 = scmp.eq.s32.totalorder %s21_s14, 0  ;;  %p32_p2 = scmp.eq.s32.totalorder %s383_s9, 0 }
   0x9   : > { %p37_p3 = scmp.ne.s32.totalorder %s375_s7, %s371_s6  ;;  %p38_p4 = scmp.eq.s32.totalorder %s418_s10, 0 }
   0xa   : > { %s434_s15 = scalar_select %p22_p1, %s379_s8, %s24_s13  }
   0xb   : > { %p436_p5 = por %p32_p2, %p31_p0  ;;  %p440_p6 = por %p38_p4, %p37_p3 }
   0xc   : > { %p61_p7 = scmp.eq.s32.totalorder %s418_s10, 1  ;;  %p67_p8 = scmp.eq.s32.totalorder %s227_s11, 1 }
   0xd   : > { %p251_p10 = scmp.lt.s32.totalorder %s383_s9, 2  ;;  %s87_s20 = sand.u32 1, %s379_s8  }
   0xe   : > { %p447_p11 = por %p61_p7, %p31_p0  ;;  %p451_p12 = por %p67_p8, %p37_p3 }
   0xf   : > { %s231_s21 = sshll.u32 %s383_s9, 7  ;;  %s230_s22 = sshll.u32 %s87_s20, 3 }
  0x10   : > { %s563_s18 = scalar_select %p447_p11, 1, 0 }
  0x11   : > { %s564_s19 = scalar_select %p451_p12, 1, 0 }
  0x12   : > { %s460_s25 = scalar_lea.hbm %s558_s0, %s231_s21  ;;  %s91_s26 = scalar_lea.vmem [#allocation2], %s230_s22 }
  0x13   : > { %s98_s27 = sshll.u32 %s91_s26, 4  ;;  %p464_p13 = pnand %p251_p10, %p436_p5  ;;  %s468_s27 = int_to_ptr.vmem [resolvable:$true] %s98_s27 }
  0x14   : > { %s88_s29 = scalar_lea.sflag [#allocation3], %s87_s20  ;;  %s287_s30 = scalar_lea.hbm %s460_s25, 128 }
  0x15   : > { %p288_p2 = scmp.ne.s32.totalorder %s460_s25, %s287_s30  ;;  %p289_p3 = pneg %p464_p13 }
  0x16   : > { %s292_s4 = scalar_lea.hbm %s558_s0, 256  ;;  %p293_p5 = scmp.lt.u32.totalorder %s460_s25, %s558_s0 }
  0x17   : > { %p290_p4 = pnand %p289_p3, %p288_p2  ;;  %p294_p8 = scmp.lt.u32.totalorder %s292_s4, %s287_s30 }
  0x18   : > { %p296_p9 = scmp.lt.u32.totalorder %s287_s30, %s460_s25 }
  0x19   : > { %p291_p7 = pneg %p290_p4  ;;  %p295_p10 = por %p294_p8, %p293_p5 }
  0x1b   : > { %p297_p0 = por %p296_p9, %p295_p10 }
  0x1d   : > { %p298_p1 = pnand %p297_p0, %p291_p7 }
  0x1f   : > { %301 = shalt.err (!%p298_p1)
}
  0x20   : > { %s302_s13 = scalar_lea.vmem %s468_s27, 128  ;;  %s385_s14 = smov [#allocation2]  }
  0x21   : > { %p303_p2 = scmp.ne.s32.totalorder %s468_s27, %s302_s13  ;;  %s307_s16 = sshll.u32 %s385_s14, 4  ;;  %s308_s16 = int_to_ptr.vmem [resolvable:$false] %s307_s16 }
  0x22   : > { %s309_s20 = scalar_lea.vmem %s308_s16, 256  ;;  %p310_p11 = scmp.lt.s32.totalorder %s468_s27, %s308_s16 }
  0x23   : > { %p305_p4 = pnand %p303_p2, %p289_p3  ;;  %p311_p5 = scmp.lt.s32.totalorder %s309_s20, %s302_s13 }
  0x25   : > { %p306_p12 = pneg %p305_p4  ;;  %p312_p8 = por %p311_p5, %p310_p11 }
  0x27   : > { %p313_p9 = pnand %p312_p8, %p306_p12 }
  0x29   : > { %316 = shalt.err (!%p313_p9)
}
  0x2a   : > { %246 = dma.hbm_to_vmem [thread:$0]  (!%p464_p13), %s460_s25, 128, %s468_s27, %s88_s29  }
  0x2b   : > { %p566_p0 = scmp.lt.s32.totalorder %s383_s9, 3  ;;  %p567_p1 = scmp.ge.s32.totalorder %s383_s9, 1 }
  0x2d   : > { %p104_p3 = pnand %p567_p1, %p566_p0 }
  0x2e   : > { %s502_s21 = sand.u32 (!%p104_p3), 1, %s375_s7  }
  0x2f   : > { %107 = sbr.rel (%p104_p3) target bundleno = 232 (0xe8), region = 24  ;;  %s233_s22 = sshll.u32 (!%p104_p3), %s502_s21, 3 }
  0x30   : > { %s110_s23 = scalar_lea.sflag (!%p104_p3), [#allocation3], %s502_s21  ;;  %s113_s24 = scalar_lea.vmem (!%p104_p3), [#allocation2], %s233_s22 }
  0x36   : > { %362 = dma.done.wait (%p440_p6), %s110_s23, 128  }
  0x37   : > { %364 = vsyncadd (%p440_p6), %s110_s23, 4294967168  ;;  %v132_v0 = vld [vmem:[%s113_s24] sm:$0xff]  ;;  %vm134_vm0 = vcmask 261120   ;;  %s236_s25 = sshll.u32 %s418_s10, 7  ;;  %s131_s26 = scalar_lea.vmem [#allocation5], %s233_s22 }
  0x38   : > { %v133_v1 = vmul.f32 %v132_v0, %v132_v0  ;;  %s157_s27 = sshll.u32 %s131_s26, 4  ;;  %s514_s29 = scalar_lea.hbm %s559_s1, %s236_s25  ;;  %s516_s27 = int_to_ptr.vmem [resolvable:$true] %s157_s27 }
  0x39   : > { %s144_s30 = scalar_lea.sflag [#allocation4], %s502_s21  ;;  %s317_s2 = scalar_lea.vmem %s516_s27, 128 }
  0x3a   : > { %v135_v2 = vsel %vm134_vm0, %v133_v1, 0.0  ;;  %p318_p6 = scmp.ne.s32.totalorder %s516_s27, %s317_s2  ;;  %p568_p11 = scmp.ne.s32.totalorder %s563_s18, 0 }
  0x3b   : > { %136 = vadd.xlane.f32.xlu0 %v135_v2  ;;  %s386_s10 = smov [#allocation5]  }
  0x3c   : > { %p319_p12 = pnand %p318_p6, %p568_p11  ;;  %s321_s3 = sshll.u32 %s386_s10, 4  ;;  %s322_s3 = int_to_ptr.vmem [resolvable:$false] %s321_s3 }
  0x3d   : > { %s323_s4 = scalar_lea.vmem %s322_s3, 256  ;;  %p324_p7 = scmp.lt.s32.totalorder %s516_s27, %s322_s3 }
  0x3e   : > { %p320_p13 = pneg %p319_p12  ;;  %p325_p10 = scmp.lt.s32.totalorder %s323_s4, %s317_s2 }
  0x40   : > { %p326_p2 = por %p325_p10, %p324_p7 }
  0x42   : > { %p327_p4 = pnand %p326_p2, %p320_p13 }
  0xc8   : > { %v137_v3 = vpop.xlane.xlu0 %136 }
  0xc9   : > { %v138_v4 = vmax.f32 %v137_v3, 1e-24 }
  0xcb   : > { %285 = vrsqrt.f32 %v138_v4 }
  0xd5   : > { %v286_v5 = vpop.eup %285 }
  0xd6   : > { %v140_v6 = vmul.f32 0.17677669, %v286_v5 }
  0xd8   : > { %v141_v7 = vmul.f32 %v140_v6, %v132_v0 }
  0xda   : > { %142 = vst.msk [vmem:[%s131_s26] sm:$0xff] %vm134_vm0, %v141_v7 }
  0xdb   : > { %330 = shalt.err (!%p327_p4)
}
  0xdc   : > { %s331_s5 = scalar_lea.hbm %s514_s29, 128  ;;  %s335_s14 = scalar_lea.hbm %s559_s1, 256 }
  0xdd   : > { %p332_p5 = scmp.ne.s32.totalorder %s514_s29, %s331_s5  ;;  %p336_p0 = scmp.lt.u32.totalorder %s514_s29, %s559_s1 }
  0xde   : > { %p337_p1 = scmp.lt.u32.totalorder %s335_s14, %s331_s5  ;;  %p339_p6 = scmp.lt.u32.totalorder %s331_s5, %s514_s29 }
  0xdf   : > { %p333_p8 = pnand %p332_p5, %p568_p11 }
  0xe0   : > { %p338_p3 = por %p337_p1, %p336_p0 }
  0xe1   : > { %p334_p9 = pneg %p333_p8 }
  0xe2   : > { %p340_p12 = por %p339_p6, %p338_p3 }
  0xe4   : > { %p341_p13 = pnand %p340_p12, %p334_p9 }
  0xe6   : > { %344 = shalt.err (!%p341_p13)
}
  0xe7   : > { %241 = dma.vmem_to_hbm [thread:$0]  (%p568_p11), %s516_s27, 128, %s514_s29, %s144_s30  }
  0xe8 PF: > { %s169_s21 = sand.u32 1, %s371_s6   ;;  %p569_p7 = scmp.ne.s32.totalorder %s564_s19, 0 }
  0xe9   : > { %p570_p10 = scmp.ge.s32.totalorder %s383_s9, 2  ;;  %s170_s22 = scalar_lea.sflag [#allocation4], %s169_s21 }
  0xeb   : > { %p248_p2 = pnand %p570_p10, %p569_p7 }
  0xed   : > { %366 = dma.done.wait (!%p248_p2), %s170_s22, 128  }
  0xee   : > { %368 = vsyncadd (!%p248_p2), %s170_s22, 4294967168  ;;  %p14_p4 = scmp.ge.s32.totalorder %s422_s12, 4   ;;  %s571_s6 = smov %s375_s7 }
  0xef   : > { %s572_s7 = smov %s379_s8  ;;  %s573_s8 = smov %s434_s15 }
  0xf0   : > { %s574_s9 = smov %s422_s12  ;;  %16 = sbr.rel (!%p14_p4) target bundleno = 5 (0x5), region = 69 }
  0xf7   :  { %175 = vsyncpa [#allocation3], 1 }
  0xf8   :  { %177 = vsyncpa [#allocation3 + $0x1], 1 }
  0xf9   :  { %178 = vsyncpa [#allocation4], 1 }
  0xfa   :  { %180 = vsyncpa [#allocation4 + $0x1], 1 }

</bundles_post_ra>
